<compile_context>
chip_gen: v7x
topology: tpu7x:2x2x1
jax: 0.10.0
libtpu: 0.0.40
codegen_flags: <defaults>
</compile_context>

<pallas_src>
import math
from functools import partial

import jax
import jax.numpy as jnp
from jax.experimental import pallas as pl
from jax.experimental.pallas import tpu as pltpu

LEAKY_SLOPE = 0.01  # PyTorch nn.LeakyReLU default negative_slope
LN_EPS = 1e-5       # PyTorch nn.LayerNorm default eps


def _leaky_relu(x):
    return jnp.where(x >= 0, x, LEAKY_SLOPE * x)


def _mlp_relu_flags(hidden_layers, last_relu=False):
    """Which MLP layers are followed by LeakyReLU (mirrors the PyTorch MLP ctor)."""
    n = len(hidden_layers)
    if n == 1:
        return (True,)
    return tuple([True] * (n - 1) + [bool(last_relu)])


def _transformer_kernel(*refs, B, S1, S2, d_model, d_k, use_layernorm, mlp_relu):
    """Whole-batch Transformer.forward in a single grid step (everything in VMEM)."""
    out_ref = refs[-1]
    it = iter(refs[:-1])

    x1 = next(it)[...]                        # (B*S1, E1)
    x2 = next(it)[...]                        # (B*S2, E2)
    w1, b1 = next(it)[...], next(it)[...]     # embedding1
    w2, b2 = next(it)[...], next(it)[...]     # embedding2
    wq, bq = next(it)[...], next(it)[...]     # query_net (pre-scaled by 1/sqrt(d_k))
    wkv, bkv = next(it)[...], next(it)[...]   # fused key_net | value_net
    if use_layernorm:
        gamma, beta = next(it)[...], next(it)[...]   # LayerNorm([1, d_model])
    mlp = [(next(it)[...], next(it)[...]) for _ in range(len(mlp_relu))]

    # Batched projections: all B*S rows in one MXU pass each.
    e1 = _leaky_relu(jnp.dot(x1, w1, preferred_element_type=jnp.float32) + b1)    # (B*S1, dm)
    e2 = _leaky_relu(jnp.dot(x2, w2, preferred_element_type=jnp.float32) + b2)    # (B*S2, dm)
    # wq/bq already carry the 1/sqrt(d_k) factor (LeakyReLU(c*z) == c*LeakyReLU(z), c>0),
    # so q is "pre-scaled" and no score multiply is needed below.
    q = _leaky_relu(jnp.dot(e1, wq, preferred_element_type=jnp.float32) + bq)     # (B*S1, dk)
    kv = _leaky_relu(jnp.dot(e2, wkv, preferred_element_type=jnp.float32) + bkv)  # (B*S2, 2dk)
    k = kv[:, :d_k]
    v = kv[:, d_k:]

    q3 = q.reshape(B, S1, d_k)
    k3 = k.reshape(B, S2, d_k)
    v3 = v.reshape(B, S2, d_k)

    # softmax(q k^T / sqrt(d_k)) v — contraction over last dims, no explicit transpose.
    s = jnp.einsum("bqd,bkd->bqk", q3, k3, preferred_element_type=jnp.float32)
    s = s - jnp.max(s, axis=-1, keepdims=True)
    p = jnp.exp(s)
    attn = p * pl.reciprocal(jnp.sum(p, axis=-1, keepdims=True), approx=True)
    av = jnp.einsum("bqk,bkd->bqd", attn, v3,
                    preferred_element_type=jnp.float32)                           # (B, S1, dk)
    x = av.reshape(B * S1, d_k)

    if use_layernorm:
        # d_k == d_model branch; S1 == 1 is guaranteed by the wrapper assert, so the
        # (B*S1, d) flat layout is exactly one row per batch element.
        e2_mean = jnp.mean(e2.reshape(B, S2, d_model), axis=1)                    # (B, dm)
        x = x + e2_mean + e1                                                      # (B, dm)
        mu = jnp.mean(x, axis=-1, keepdims=True)
        var = jnp.mean((x - mu) ** 2, axis=-1, keepdims=True)
        x = (x - mu) * jax.lax.rsqrt(var + LN_EPS) * gamma + beta

    # MLP head (last layer's output columns are zero-padded to the lane-dense width).
    for (mw, mb), relu in zip(mlp, mlp_relu):
        x = jnp.dot(x, mw, preferred_element_type=jnp.float32) + mb
        if relu:
            x = _leaky_relu(x)

    n = x.shape[-1]
    if n == out_ref.shape[-1]:
        out_ref[...] = x.astype(out_ref.dtype)          # dense 128-lane store
    else:
        # No MLP head: zero-fill then write the valid columns (static sub-slice store).
        out_ref[...] = jnp.zeros(out_ref.shape, out_ref.dtype)
        out_ref[:, :n] = x.astype(out_ref.dtype)


def init_params(key, input_emb1, input_emb2, d_model, d_k, mlp_hidden_layers):
    """Deterministic synthetic parameters (xavier_uniform w/ leaky_relu gain)."""
    gain = math.sqrt(2.0 / (1.0 + LEAKY_SLOPE ** 2))  # nn.init.calculate_gain('leaky_relu')

    def xavier(k, fi, fo):
        bound = gain * math.sqrt(6.0 / (fi + fo))
        return jax.random.uniform(k, (fi, fo), jnp.float32, -bound, bound)

    def bias(k, fi, fo):
        bound = 1.0 / math.sqrt(fi)
        return jax.random.uniform(k, (1, fo), jnp.float32, -bound, bound)

    keys = iter(jax.random.split(key, 64))
    p = []
    for fi, fo in [(input_emb1, d_model), (input_emb2, d_model),
                   (d_model, d_k), (d_model, d_k), (d_model, d_k)]:
        p.append(xavier(next(keys), fi, fo))
        p.append(bias(next(keys), fi, fo))
    if d_k == d_model:
        p.append(jnp.ones((1, d_model), jnp.float32))    # LayerNorm weight
        p.append(jnp.zeros((1, d_model), jnp.float32))   # LayerNorm bias
    if mlp_hidden_layers is not None:
        fi = 2 * d_model                                  # MLP input size per the module
        for fo in mlp_hidden_layers:
            p.append(xavier(next(keys), fi, fo))
            p.append(bias(next(keys), fi, fo))
            fi = fo
    return p


def transformer_forward(inp1, inp2, params, *, d_model, d_k, mlp_hidden_layers):
    B, S1, E1 = inp1.shape
    B2, S2, E2 = inp2.shape
    assert B == B2
    use_layernorm = (d_k == d_model)
    if use_layernorm:
        # PyTorch module asserts attention_value / emb2_mean / emb1 shapes match -> S1 == 1.
        assert S1 == 1, "LayerNorm branch of Transformer requires S1 == 1"

    # ---- unpack params; fuse K|V weights; fold attention scale into Q weights.
    it = iter(params)
    w1, b1 = next(it), next(it)
    w2, b2 = next(it), next(it)
    wq, bq = next(it), next(it)
    wk, bk = next(it), next(it)
    wv, bv = next(it), next(it)

    scale = 1.0 / math.sqrt(d_k)
    wq_s, bq_s = wq * scale, bq * scale                 # LeakyReLU is positively homogeneous
    wkv = jnp.concatenate([wk, wv], axis=1)
    bkv = jnp.concatenate([bk, bv], axis=1)
    kern_params = [w1, b1, w2, b2, wq_s, bq_s, wkv, bkv]
    if use_layernorm:
        kern_params += [next(it), next(it)]

    relu_flags = []
    mlp_wb = []
    if mlp_hidden_layers is not None:
        relu_flags = list(_mlp_relu_flags(mlp_hidden_layers))
        for _ in mlp_hidden_layers:
            mlp_wb.append((next(it), next(it)))

    out_dim = (mlp_hidden_layers[-1] if mlp_hidden_layers is not None
               else (d_model if use_layernorm else d_k))
    out_pad = ((out_dim + 127) // 128) * 128            # lane-dense (multiple of 128) store

    if mlp_wb:
        # Zero-pad the last MLP layer's output columns so the kernel's final store is dense
        # (free on the MXU: the output tile is padded to 128 lanes anyway).
        lw, lb = mlp_wb[-1]
        pad = out_pad - lw.shape[1]
        if pad:
            lw = jnp.concatenate([lw, jnp.zeros((lw.shape[0], pad), lw.dtype)], axis=1)
            lb = jnp.concatenate([lb, jnp.zeros((1, pad), lb.dtype)], axis=1)
            mlp_wb[-1] = (lw, lb)
    for w, b in mlp_wb:
        kern_params += [w, b]

    rows1 = B * S1
    inp1_flat = inp1.reshape(rows1, E1)
    inp2_flat = inp2.reshape(B * S2, E2)

    kernel = partial(_transformer_kernel, B=B, S1=S1, S2=S2, d_model=d_model, d_k=d_k,
                     use_layernorm=use_layernorm, mlp_relu=tuple(relu_flags))

    in_specs = ([pl.BlockSpec(inp1_flat.shape, lambda i: (0, 0)),
                 pl.BlockSpec(inp2_flat.shape, lambda i: (0, 0))]
                + [pl.BlockSpec(p.shape, lambda i: (0, 0)) for p in kern_params])
    out_specs = pl.BlockSpec((rows1, out_pad), lambda i: (0, 0))

    # Whole forward pass in one grid step: every matmul sees all B*S rows at once.
    # TODO(synk): on v7x (2 TCs/chip) split the batch into two balanced grid chunks.
    out_flat = pl.pallas_call(
        kernel,
        out_shape=jax.ShapeDtypeStruct((rows1, out_pad), jnp.float32),
        grid=(1,),
        in_specs=in_specs,
        out_specs=out_specs,
        compiler_params=pltpu.CompilerParams(dimension_semantics=("arbitrary",)),
    )(inp1_flat, inp2_flat, *kern_params)

    return out_flat[:, :out_dim].reshape(B, S1, out_dim)


def transformer_reference(inp1, inp2, params, *, d_model, d_k, mlp_hidden_layers):
    """Pure-JAX reference mirroring the PyTorch forward (uses the unfused params)."""
    it = iter(params)
    w1, b1 = next(it), next(it)
    w2, b2 = next(it), next(it)
    wq, bq = next(it), next(it)
    wk, bk = next(it), next(it)
    wv, bv = next(it), next(it)
    use_layernorm = (d_k == d_model)
    if use_layernorm:
        gamma, beta = next(it), next(it)

    e1 = _leaky_relu(inp1 @ w1 + b1)
    e2 = _leaky_relu(inp2 @ w2 + b2)
    q = _leaky_relu(e1 @ wq + bq)
    k = _leaky_relu(e2 @ wk + bk)
    v = _leaky_relu(e2 @ wv + bv)
    s = jnp.einsum("bqd,bkd->bqk", q, k) / math.sqrt(d_k)
    attn = jax.nn.softmax(s, axis=-1)
    av = jnp.einsum("bqk,bkd->bqd", attn, v)
    if use_layernorm:
        e2_mean = jnp.mean(e2, axis=1, keepdims=True)
        x = av + e2_mean + e1
        mu = jnp.mean(x, axis=(1, 2), keepdims=True)
        var = jnp.mean((x - mu) ** 2, axis=(1, 2), keepdims=True)
        x = (x - mu) * jax.lax.rsqrt(var + LN_EPS) * gamma + beta
    else:
        x = av
    if mlp_hidden_layers is not None:
        for relu in _mlp_relu_flags(mlp_hidden_layers):
            w, b = next(it), next(it)
            x = x @ w + b
            if relu:
                x = _leaky_relu(x)
    return x


if __name__ == "__main__":
    key = jax.random.PRNGKey(0)
    ka1, ka2, kap, kb1, kb2, kbp = jax.random.split(key, 6)

    # --- Config A: d_k == d_model -> attention + mean(emb2) residual + LayerNorm path
    B, S1, S2 = 2, 1, 8                      # S1 must be 1 (module asserts shapes match)
    input_emb1, input_emb2, d_model, d_k = 16, 24, 32, 32
    inp1 = jax.random.normal(ka1, (B, S1, input_emb1), jnp.float32)
    inp2 = jax.random.normal(ka2, (B, S2, input_emb2), jnp.float32)
    params = init_params(kap, input_emb1, input_emb2, d_model, d_k, None)
    out_a = jax.block_until_ready(
        transformer_forward(inp1, inp2, params,
                            d_model=d_model, d_k=d_k, mlp_hidden_layers=None))
    ref_a = transformer_reference(inp1, inp2, params,
                                  d_model=d_model, d_k=d_k, mlp_hidden_layers=None)
    assert out_a.shape == (B, S1, d_model)
    assert jnp.allclose(out_a, ref_a, rtol=5e-2, atol=5e-2), "config A mismatch"

    # --- Config B: d_k == 2*d_model -> attention output fed to the MLP head
    # (the only shape-consistent MLP configuration given MLP input = 2*d_model)
    B2_, S1b, S2b = 2, 4, 8
    ie1b, ie2b, d_model_b, d_k_b = 16, 24, 16, 32
    mlp_hidden = [32, 16]
    inp1b = jax.random.normal(kb1, (B2_, S1b, ie1b), jnp.float32)
    inp2b = jax.random.normal(kb2, (B2_, S2b, ie2b), jnp.float32)
    params_b = init_params(kbp, ie1b, ie2b, d_model_b, d_k_b, mlp_hidden)
    out_b = jax.block_until_ready(
        transformer_forward(inp1b, inp2b, params_b,
                            d_model=d_model_b, d_k=d_k_b, mlp_hidden_layers=mlp_hidden))
    ref_b = transformer_reference(inp1b, inp2b, params_b,
                                  d_model=d_model_b, d_k=d_k_b, mlp_hidden_layers=mlp_hidden)
    assert out_b.shape == (B2_, S1b, mlp_hidden[-1])
    assert jnp.allclose(out_b, ref_b, rtol=5e-2, atol=5e-2), "config B mismatch"

    print("KERNEL_OK")
</pallas_src>

<mosaic_0001>
module attributes {stable_mosaic.version = 11 : i64} {
  func.func @_transformer_kernel(%arg0: i32, %arg1: memref<2x16xf32, #tpu.memory_space<vmem>>, %arg2: memref<16x24xf32, #tpu.memory_space<vmem>>, %arg3: memref<16x32xf32, #tpu.memory_space<vmem>>, %arg4: memref<1x32xf32, #tpu.memory_space<vmem>>, %arg5: memref<24x32xf32, #tpu.memory_space<vmem>>, %arg6: memref<1x32xf32, #tpu.memory_space<vmem>>, %arg7: memref<32x32xf32, #tpu.memory_space<vmem>>, %arg8: memref<1x32xf32, #tpu.memory_space<vmem>>, %arg9: memref<32x64xf32, #tpu.memory_space<vmem>>, %arg10: memref<1x64xf32, #tpu.memory_space<vmem>>, %arg11: memref<1x32xf32, #tpu.memory_space<vmem>>, %arg12: memref<1x32xf32, #tpu.memory_space<vmem>>, %arg13: memref<2x128xf32, #tpu.memory_space<vmem>>) attributes {dimension_semantics = [#tpu.dimension_semantics<arbitrary>], iteration_bounds = array<i64: 1>, scalar_prefetch = 0 : i64, scratch_operands = 0 : i64, tpu.core_type = #tpu.core_type<tc>, window_params = [{pipeline_mode = #tpu.pipeline_mode<synchronous>, transform_indices = @transform_0, window_bounds = array<i64: 2, 16>}, {pipeline_mode = #tpu.pipeline_mode<synchronous>, transform_indices = @transform_1, window_bounds = array<i64: 16, 24>}, {pipeline_mode = #tpu.pipeline_mode<synchronous>, transform_indices = @transform_2, window_bounds = array<i64: 16, 32>}, {pipeline_mode = #tpu.pipeline_mode<synchronous>, transform_indices = @transform_3, window_bounds = array<i64: 1, 32>}, {pipeline_mode = #tpu.pipeline_mode<synchronous>, transform_indices = @transform_4, window_bounds = array<i64: 24, 32>}, {pipeline_mode = #tpu.pipeline_mode<synchronous>, transform_indices = @transform_5, window_bounds = array<i64: 1, 32>}, {pipeline_mode = #tpu.pipeline_mode<synchronous>, transform_indices = @transform_6, window_bounds = array<i64: 32, 32>}, {pipeline_mode = #tpu.pipeline_mode<synchronous>, transform_indices = @transform_7, window_bounds = array<i64: 1, 32>}, {pipeline_mode = #tpu.pipeline_mode<synchronous>, transform_indices = @transform_8, window_bounds = array<i64: 32, 64>}, {pipeline_mode = #tpu.pipeline_mode<synchronous>, transform_indices = @transform_9, window_bounds = array<i64: 1, 64>}, {pipeline_mode = #tpu.pipeline_mode<synchronous>, transform_indices = @transform_10, window_bounds = array<i64: 1, 32>}, {pipeline_mode = #tpu.pipeline_mode<synchronous>, transform_indices = @transform_11, window_bounds = array<i64: 1, 32>}, {pipeline_mode = #tpu.pipeline_mode<synchronous>, transform_indices = @transform_12, window_bounds = array<i64: 2, 128>}]} {
    %c0 = arith.constant 0 : index
    %c0_0 = arith.constant 0 : index
    %0 = vector.load %arg1[%c0, %c0_0] : memref<2x16xf32, #tpu.memory_space<vmem>>, vector<2x16xf32>
    %c0_1 = arith.constant 0 : index
    %c0_2 = arith.constant 0 : index
    %1 = vector.load %arg2[%c0_1, %c0_2] : memref<16x24xf32, #tpu.memory_space<vmem>>, vector<16x24xf32>
    %c0_3 = arith.constant 0 : index
    %c0_4 = arith.constant 0 : index
    %2 = vector.load %arg3[%c0_3, %c0_4] : memref<16x32xf32, #tpu.memory_space<vmem>>, vector<16x32xf32>
    %c0_5 = arith.constant 0 : index
    %c0_6 = arith.constant 0 : index
    %3 = vector.load %arg4[%c0_5, %c0_6] : memref<1x32xf32, #tpu.memory_space<vmem>>, vector<1x32xf32>
    %c0_7 = arith.constant 0 : index
    %c0_8 = arith.constant 0 : index
    %4 = vector.load %arg5[%c0_7, %c0_8] : memref<24x32xf32, #tpu.memory_space<vmem>>, vector<24x32xf32>
    %c0_9 = arith.constant 0 : index
    %c0_10 = arith.constant 0 : index
    %5 = vector.load %arg6[%c0_9, %c0_10] : memref<1x32xf32, #tpu.memory_space<vmem>>, vector<1x32xf32>
    %c0_11 = arith.constant 0 : index
    %c0_12 = arith.constant 0 : index
    %6 = vector.load %arg7[%c0_11, %c0_12] : memref<32x32xf32, #tpu.memory_space<vmem>>, vector<32x32xf32>
    %c0_13 = arith.constant 0 : index
    %c0_14 = arith.constant 0 : index
    %7 = vector.load %arg8[%c0_13, %c0_14] : memref<1x32xf32, #tpu.memory_space<vmem>>, vector<1x32xf32>
    %c0_15 = arith.constant 0 : index
    %c0_16 = arith.constant 0 : index
    %8 = vector.load %arg9[%c0_15, %c0_16] : memref<32x64xf32, #tpu.memory_space<vmem>>, vector<32x64xf32>
    %c0_17 = arith.constant 0 : index
    %c0_18 = arith.constant 0 : index
    %9 = vector.load %arg10[%c0_17, %c0_18] : memref<1x64xf32, #tpu.memory_space<vmem>>, vector<1x64xf32>
    %c0_19 = arith.constant 0 : index
    %c0_20 = arith.constant 0 : index
    %10 = vector.load %arg11[%c0_19, %c0_20] : memref<1x32xf32, #tpu.memory_space<vmem>>, vector<1x32xf32>
    %c0_21 = arith.constant 0 : index
    %c0_22 = arith.constant 0 : index
    %11 = vector.load %arg12[%c0_21, %c0_22] : memref<1x32xf32, #tpu.memory_space<vmem>>, vector<1x32xf32>
    %cst = arith.constant dense<0.000000e+00> : vector<2x32xf32>
    %12 = tpu.matmul %0, %2, %cst {dimension_numbers = #tpu.dot_dimension_numbers<[1], [0], [0], [1], [0, 0, 1, 1], [], []>} : vector<2x16xf32>, vector<16x32xf32>, vector<2x32xf32> -> vector<2x32xf32>
    %13 = vector.broadcast %3 : vector<1x32xf32> to vector<2x32xf32>
    %14 = arith.addf %12, %13 : vector<2x32xf32>
    %cst_23 = arith.constant 0.000000e+00 : f32
    %15 = vector.broadcast %cst_23 : f32 to vector<2x32xf32>
    %16 = arith.cmpf oge, %14, %15 : vector<2x32xf32>
    %cst_24 = arith.constant 0.00999999977 : f32
    %17 = vector.broadcast %cst_24 : f32 to vector<2x32xf32>
    %18 = arith.mulf %17, %14 : vector<2x32xf32>
    %19 = arith.select %16, %14, %18 : vector<2x32xi1>, vector<2x32xf32>
    %cst_25 = arith.constant dense<0.000000e+00> : vector<16x32xf32>
    %20 = tpu.matmul %1, %4, %cst_25 {dimension_numbers = #tpu.dot_dimension_numbers<[1], [0], [0], [1], [0, 0, 1, 1], [], []>} : vector<16x24xf32>, vector<24x32xf32>, vector<16x32xf32> -> vector<16x32xf32>
    %21 = vector.broadcast %5 : vector<1x32xf32> to vector<16x32xf32>
    %22 = arith.addf %20, %21 : vector<16x32xf32>
    %cst_26 = arith.constant 0.000000e+00 : f32
    %23 = vector.broadcast %cst_26 : f32 to vector<16x32xf32>
    %24 = arith.cmpf oge, %22, %23 : vector<16x32xf32>
    %cst_27 = arith.constant 0.00999999977 : f32
    %25 = vector.broadcast %cst_27 : f32 to vector<16x32xf32>
    %26 = arith.mulf %25, %22 : vector<16x32xf32>
    %27 = arith.select %24, %22, %26 : vector<16x32xi1>, vector<16x32xf32>
    %cst_28 = arith.constant dense<0.000000e+00> : vector<2x32xf32>
    %28 = tpu.matmul %19, %6, %cst_28 {dimension_numbers = #tpu.dot_dimension_numbers<[1], [0], [0], [1], [0, 0, 1, 1], [], []>} : vector<2x32xf32>, vector<32x32xf32>, vector<2x32xf32> -> vector<2x32xf32>
    %29 = vector.broadcast %7 : vector<1x32xf32> to vector<2x32xf32>
    %30 = arith.addf %28, %29 : vector<2x32xf32>
    %cst_29 = arith.constant 0.000000e+00 : f32
    %31 = vector.broadcast %cst_29 : f32 to vector<2x32xf32>
    %32 = arith.cmpf oge, %30, %31 : vector<2x32xf32>
    %cst_30 = arith.constant 0.00999999977 : f32
    %33 = vector.broadcast %cst_30 : f32 to vector<2x32xf32>
    %34 = arith.mulf %33, %30 : vector<2x32xf32>
    %35 = arith.select %32, %30, %34 : vector<2x32xi1>, vector<2x32xf32>
    %cst_31 = arith.constant dense<0.000000e+00> : vector<16x64xf32>
    %36 = tpu.matmul %27, %8, %cst_31 {dimension_numbers = #tpu.dot_dimension_numbers<[1], [0], [0], [1], [0, 0, 1, 1], [], []>} : vector<16x32xf32>, vector<32x64xf32>, vector<16x64xf32> -> vector<16x64xf32>
    %37 = vector.broadcast %9 : vector<1x64xf32> to vector<16x64xf32>
    %38 = arith.addf %36, %37 : vector<16x64xf32>
    %cst_32 = arith.constant 0.000000e+00 : f32
    %39 = vector.broadcast %cst_32 : f32 to vector<16x64xf32>
    %40 = arith.cmpf oge, %38, %39 : vector<16x64xf32>
    %cst_33 = arith.constant 0.00999999977 : f32
    %41 = vector.broadcast %cst_33 : f32 to vector<16x64xf32>
    %42 = arith.mulf %41, %38 : vector<16x64xf32>
    %43 = arith.select %40, %38, %42 : vector<16x64xi1>, vector<16x64xf32>
    %44 = vector.extract_strided_slice %43 {offsets = [0, 0], sizes = [16, 32], strides = [1, 1]} : vector<16x64xf32> to vector<16x32xf32>
    %45 = vector.extract_strided_slice %43 {offsets = [0, 32], sizes = [16, 32], strides = [1, 1]} : vector<16x64xf32> to vector<16x32xf32>
    %46 = vector.shape_cast %35 : vector<2x32xf32> to vector<2x1x32xf32>
    %47 = vector.shape_cast %44 : vector<16x32xf32> to vector<2x8x32xf32>
    %48 = vector.shape_cast %45 : vector<16x32xf32> to vector<2x8x32xf32>
    "tpu.trace_start"() <{level = 10 : i32, message = "bqd,bkd->bqk"}> : () -> ()
    %cst_34 = arith.constant dense<0.000000e+00> : vector<2x1x8xf32>
    %49 = tpu.matmul %46, %47, %cst_34 {dimension_numbers = #tpu.dot_dimension_numbers<[2], [2], [1], [1], [0, 0, 0, 1, 1, 1], [0], [0]>} : vector<2x1x32xf32>, vector<2x8x32xf32>, vector<2x1x8xf32> -> vector<2x1x8xf32>
    "tpu.trace_stop"() : () -> ()
    %cst_35 = arith.constant dense<0xFF800000> : vector<2x1xf32>
    %50 = vector.multi_reduction <maximumf>, %49, %cst_35 [2] : vector<2x1x8xf32> to vector<2x1xf32>
    %51 = vector.shape_cast %50 : vector<2x1xf32> to vector<2x1x1xf32>
    %52 = vector.broadcast %51 : vector<2x1x1xf32> to vector<2x1x8xf32>
    %53 = arith.subf %49, %52 : vector<2x1x8xf32>
    %54 = math.exp %53 : vector<2x1x8xf32>
    %cst_36 = arith.constant dense<0.000000e+00> : vector<2x1xf32>
    %55 = vector.multi_reduction <add>, %54, %cst_36 [2] : vector<2x1x8xf32> to vector<2x1xf32>
    %56 = vector.shape_cast %55 : vector<2x1xf32> to vector<2x1x1xf32>
    %57 = tpu.reciprocal %56 {approx = true} : vector<2x1x1xf32> -> vector<2x1x1xf32>
    %58 = vector.broadcast %57 : vector<2x1x1xf32> to vector<2x1x8xf32>
    %59 = arith.mulf %54, %58 : vector<2x1x8xf32>
    "tpu.trace_start"() <{level = 10 : i32, message = "bqk,bkd->bqd"}> : () -> ()
    %cst_37 = arith.constant dense<0.000000e+00> : vector<2x1x32xf32>
    %60 = tpu.matmul %59, %48, %cst_37 {dimension_numbers = #tpu.dot_dimension_numbers<[2], [1], [1], [2], [0, 0, 0, 1, 1, 2], [0], [0]>} : vector<2x1x8xf32>, vector<2x8x32xf32>, vector<2x1x32xf32> -> vector<2x1x32xf32>
    "tpu.trace_stop"() : () -> ()
    %61 = vector.shape_cast %60 : vector<2x1x32xf32> to vector<2x32xf32>
    %62 = vector.shape_cast %27 : vector<16x32xf32> to vector<2x8x32xf32>
    %cst_38 = arith.constant dense<0.000000e+00> : vector<2x32xf32>
    %63 = vector.multi_reduction <add>, %62, %cst_38 [1] : vector<2x8x32xf32> to vector<2x32xf32>
    %cst_39 = arith.constant 8.000000e+00 : f32
    %64 = vector.broadcast %cst_39 : f32 to vector<2x32xf32>
    %65 = arith.divf %63, %64 : vector<2x32xf32>
    %66 = arith.addf %61, %65 : vector<2x32xf32>
    %67 = arith.addf %66, %19 : vector<2x32xf32>
    %cst_40 = arith.constant dense<0.000000e+00> : vector<2xf32>
    %68 = vector.multi_reduction <add>, %67, %cst_40 [1] : vector<2x32xf32> to vector<2xf32>
    %69 = vector.shape_cast %68 : vector<2xf32> to vector<2x1xf32>
    %cst_41 = arith.constant 3.200000e+01 : f32
    %70 = vector.broadcast %cst_41 : f32 to vector<2x1xf32>
    %71 = arith.divf %69, %70 : vector<2x1xf32>
    %72 = vector.broadcast %71 : vector<2x1xf32> to vector<2x32xf32>
    %73 = arith.subf %67, %72 : vector<2x32xf32>
    %74 = arith.mulf %73, %73 : vector<2x32xf32>
    %cst_42 = arith.constant dense<0.000000e+00> : vector<2xf32>
    %75 = vector.multi_reduction <add>, %74, %cst_42 [1] : vector<2x32xf32> to vector<2xf32>
    %76 = vector.shape_cast %75 : vector<2xf32> to vector<2x1xf32>
    %cst_43 = arith.constant 3.200000e+01 : f32
    %77 = vector.broadcast %cst_43 : f32 to vector<2x1xf32>
    %78 = arith.divf %76, %77 : vector<2x1xf32>
    %79 = vector.broadcast %71 : vector<2x1xf32> to vector<2x32xf32>
    %80 = arith.subf %67, %79 : vector<2x32xf32>
    %cst_44 = arith.constant 9.99999974E-6 : f32
    %81 = vector.broadcast %cst_44 : f32 to vector<2x1xf32>
    %82 = arith.addf %78, %81 : vector<2x1xf32>
    %83 = math.rsqrt %82 : vector<2x1xf32>
    %84 = vector.broadcast %83 : vector<2x1xf32> to vector<2x32xf32>
    %85 = arith.mulf %80, %84 : vector<2x32xf32>
    %86 = vector.broadcast %10 : vector<1x32xf32> to vector<2x32xf32>
    %87 = arith.mulf %85, %86 : vector<2x32xf32>
    %88 = vector.broadcast %11 : vector<1x32xf32> to vector<2x32xf32>
    %89 = arith.addf %87, %88 : vector<2x32xf32>
    %cst_45 = arith.constant 0.000000e+00 : f32
    %90 = vector.broadcast %cst_45 : f32 to vector<2x128xf32>
    %c0_46 = arith.constant 0 : index
    %c0_47 = arith.constant 0 : index
    %91 = vector.load %arg13[%c0_46, %c0_47] : memref<2x128xf32, #tpu.memory_space<vmem>>, vector<2x128xf32>
    tpu.vector_store %arg13[%c0_46, %c0_47], %90 {strides = array<i32>} : memref<2x128xf32, #tpu.memory_space<vmem>>, vector<2x128xf32>,
    %c0_48 = arith.constant 0 : index
    %c0_49 = arith.constant 0 : index
    %92 = vector.load %arg13[%c0_48, %c0_49] : memref<2x128xf32, #tpu.memory_space<vmem>>, vector<2x32xf32>
    tpu.vector_store %arg13[%c0_48, %c0_49], %89 {strides = array<i32>} : memref<2x128xf32, #tpu.memory_space<vmem>>, vector<2x32xf32>,
    return
  }
  func.func @transform_0(%arg0: i32) -> (i32, i32) {
    %c0_i32 = arith.constant 0 : i32
    %c0_i32_0 = arith.constant 0 : i32
    %c0_i32_1 = arith.constant 0 : i32
    return %c0_i32, %c0_i32_0 : i32, i32
  }
  func.func @transform_1(%arg0: i32) -> (i32, i32) {
    %c0_i32 = arith.constant 0 : i32
    %c0_i32_0 = arith.constant 0 : i32
    %c0_i32_1 = arith.constant 0 : i32
    return %c0_i32, %c0_i32_0 : i32, i32
  }
  func.func @transform_2(%arg0: i32) -> (i32, i32) {
    %c0_i32 = arith.constant 0 : i32
    %c0_i32_0 = arith.constant 0 : i32
    %c0_i32_1 = arith.constant 0 : i32
    return %c0_i32, %c0_i32_0 : i32, i32
  }
  func.func @transform_3(%arg0: i32) -> (i32, i32) {
    %c0_i32 = arith.constant 0 : i32
    %c0_i32_0 = arith.constant 0 : i32
    %c0_i32_1 = arith.constant 0 : i32
    return %c0_i32, %c0_i32_0 : i32, i32
  }
  func.func @transform_4(%arg0: i32) -> (i32, i32) {
    %c0_i32 = arith.constant 0 : i32
    %c0_i32_0 = arith.constant 0 : i32
    %c0_i32_1 = arith.constant 0 : i32
    return %c0_i32, %c0_i32_0 : i32, i32
  }
  func.func @transform_5(%arg0: i32) -> (i32, i32) {
    %c0_i32 = arith.constant 0 : i32
    %c0_i32_0 = arith.constant 0 : i32
    %c0_i32_1 = arith.constant 0 : i32
    return %c0_i32, %c0_i32_0 : i32, i32
  }
  func.func @transform_6(%arg0: i32) -> (i32, i32) {
    %c0_i32 = arith.constant 0 : i32
    %c0_i32_0 = arith.constant 0 : i32
    %c0_i32_1 = arith.constant 0 : i32
    return %c0_i32, %c0_i32_0 : i32, i32
  }
  func.func @transform_7(%arg0: i32) -> (i32, i32) {
    %c0_i32 = arith.constant 0 : i32
    %c0_i32_0 = arith.constant 0 : i32
    %c0_i32_1 = arith.constant 0 : i32
    return %c0_i32, %c0_i32_0 : i32, i32
  }
  func.func @transform_8(%arg0: i32) -> (i32, i32) {
    %c0_i32 = arith.constant 0 : i32
    %c0_i32_0 = arith.constant 0 : i32
    %c0_i32_1 = arith.constant 0 : i32
    return %c0_i32, %c0_i32_0 : i32, i32
  }
  func.func @transform_9(%arg0: i32) -> (i32, i32) {
    %c0_i32 = arith.constant 0 : i32
    %c0_i32_0 = arith.constant 0 : i32
    %c0_i32_1 = arith.constant 0 : i32
    return %c0_i32, %c0_i32_0 : i32, i32
  }
  func.func @transform_10(%arg0: i32) -> (i32, i32) {
    %c0_i32 = arith.constant 0 : i32
    %c0_i32_0 = arith.constant 0 : i32
    %c0_i32_1 = arith.constant 0 : i32
    return %c0_i32, %c0_i32_0 : i32, i32
  }
  func.func @transform_11(%arg0: i32) -> (i32, i32) {
    %c0_i32 = arith.constant 0 : i32
    %c0_i32_0 = arith.constant 0 : i32
    %c0_i32_1 = arith.constant 0 : i32
    return %c0_i32, %c0_i32_0 : i32, i32
  }
  func.func @transform_12(%arg0: i32) -> (i32, i32) {
    %c0_i32 = arith.constant 0 : i32
    %c0_i32_0 = arith.constant 0 : i32
    %c0_i32_1 = arith.constant 0 : i32
    return %c0_i32, %c0_i32_0 : i32, i32
  }
}

</mosaic_0001>

<bundles_post_ra>
// kernel: tpu_custom_call.1
= control target key start
LH: loop header
LB: loop body
LE: loop exit
PB: predicated region body
PF: predicated region fallthrough
CT: control target
= control target key end

     0   :  { %17 = vsyncpa [#allocation3], 0  ;;  %s1507_s0 = inlined_call_operand.hbm [shape: f32[2,16], index: 0, kind: input, shape index: {}]   ;;  %s1508_s1 = inlined_call_operand.hbm [shape: f32[16,24], index: 1, kind: input, shape index: {}]   ;;  %s1509_s2 = inlined_call_operand.hbm [shape: f32[16,32], index: 2, kind: input, shape index: {}]   ;;  %s1510_s3 = inlined_call_operand.vmem [shape: f32[1,32], index: 3, kind: input, shape index: {}]   ;;  %s1511_s4 = inlined_call_operand.hbm [shape: f32[24,32], index: 4, kind: input, shape index: {}]   ;;  %s1512_s5 = inlined_call_operand.vmem [shape: f32[1,32], index: 5, kind: input, shape index: {}]   ;;  %s1513_s6 = inlined_call_operand.hbm [shape: f32[32,32], index: 6, kind: input, shape index: {}]   ;;  %s1514_s7 = inlined_call_operand.vmem [shape: f32[1,32], index: 7, kind: input, shape index: {}]   ;;  %s1515_s8 = inlined_call_operand.hbm [shape: f32[32,64], index: 8, kind: input, shape index: {}]   ;;  %s1516_s9 = inlined_call_operand.vmem [shape: f32[1,64], index: 9, kind: input, shape index: {}]   ;;  %s1517_s10 = inlined_call_operand.vmem [shape: f32[1,32], index: 10, kind: input, shape index: {}]   ;;  %s1518_s11 = inlined_call_operand.vmem [shape: f32[1,32], index: 11, kind: input, shape index: {}]   ;;  %s1519_s12 = inlined_call_operand.hbm [shape: f32[2,128], index: 12, kind: output, shape index: {}]  }
   0x1   :  { %18 = vsyncpa [#allocation6], 0 }
   0x2   :  { %19 = vsyncpa [#allocation9], 0 }
   0x3   :  { %20 = vsyncpa [#allocation12], 0 }
   0x4   :  { %21 = vsyncpa [#allocation4], 0  ;;  %s1260_s21 = smov [#allocation5]   ;;  %s1096_s25 = scalar_lea.hbm %s1508_s1, 256 }
   0x5   :  { %s37_s22 = sshll.u32 %s1260_s21, 4  ;;  %p1097_p0 = scmp.ne.s32.totalorder %s1508_s1, %s1096_s25  ;;  %s38_s22 = int_to_ptr.vmem [resolvable:$true] %s37_s22 }
   0x6   :  { %p1100_p1 = scmp.lt.u32.totalorder %s1096_s25, %s1508_s1 }
   0x8   :  { %p1102_p2 = pnand %p1100_p1, %p1097_p0 }
   0xa   :  { %1105 = shalt.err (!%p1102_p2)
}
   0xb   :  { %s1106_s30 = scalar_lea.vmem %s38_s22, 256  ;;  %p1111_p4 = scmp.lt.s32.totalorder %s38_s22, %s38_s22 }
   0xc   :  { %p1107_p3 = scmp.ne.s32.totalorder %s38_s22, %s1106_s30  ;;  %p1112_p5 = scmp.lt.s32.totalorder %s1106_s30, %s1106_s30 }
   0xe   :  { %p1113_p6 = por %p1112_p5, %p1111_p4 }
  0x10   :  { %p1114_p7 = pnand %p1113_p6, %p1107_p3 }
  0x12   :  { %1117 = shalt.err (!%p1114_p7)
}
  0x13   :  { %s1261_s13 = smov 128   ;;  %s1262_s14 = smov 8  }
  0x14   :  { %43 = dma.hbm_to_vmem [thread:$0]  %s1508_s1, 256, %s38_s22, [#allocation6], %s1261_s13, %s1261_s13, %s1262_s14  }
  0x15   :  { %s1263_s17 = smov [#allocation8]   ;;  %s1264_s19 = smov [#allocation2]  }
  0x16   :  { %s63_s18 = sshll.u32 %s1263_s17, 4  ;;  %s28_s20 = sshll.u32 %s1264_s19, 4  ;;  %s64_s18 = int_to_ptr.vmem [resolvable:$true] %s63_s18  ;;  %s29_s20 = int_to_ptr.vmem [resolvable:$true] %s28_s20 }
  0x17   :  { %s1118_s24 = scalar_lea.hbm %s1511_s4, 384 }
  0x18   :  { %p1119_p8 = scmp.ne.s32.totalorder %s1511_s4, %s1118_s24  ;;  %p1122_p9 = scmp.lt.u32.totalorder %s1118_s24, %s1511_s4 }
  0x1a   :  { %p1124_p10 = pnand %p1122_p9, %p1119_p8 }
  0x1c   :  { %1127 = shalt.err (!%p1124_p10)
}
  0x1d   :  { %s1128_s1 = scalar_lea.vmem %s64_s18, 384  ;;  %p1133_p12 = scmp.lt.s32.totalorder %s64_s18, %s64_s18 }
  0x1e   :  { %p1129_p11 = scmp.ne.s32.totalorder %s64_s18, %s1128_s1  ;;  %p1134_p13 = scmp.lt.s32.totalorder %s1128_s1, %s1128_s1 }
  0x20   :  { %p1135_p0 = por %p1134_p13, %p1133_p12 }
  0x22   :  { %p1136_p1 = pnand %p1135_p0, %p1129_p11 }
  0x24   :  { %1139 = shalt.err (!%p1136_p1)
}
  0x25   :  { %69 = dma.hbm_to_vmem [thread:$0]  %s1511_s4, 384, %s64_s18, [#allocation9], %s1261_s13, %s1261_s13, %s1262_s14  }
  0x26   :  { %s1140_s16 = scalar_lea.hbm %s1507_s0, 32 }
  0x27   :  { %p1141_p2 = scmp.ne.s32.totalorder %s1507_s0, %s1140_s16  ;;  %p1144_p3 = scmp.lt.u32.totalorder %s1140_s16, %s1507_s0 }
  0x29   :  { %p1146_p4 = pnand %p1144_p3, %p1141_p2 }
  0x2b   :  { %1149 = shalt.err (!%p1146_p4)
}
  0x2c   :  { %s1150_s24 = scalar_lea.vmem %s29_s20, 32  ;;  %p1155_p6 = scmp.lt.s32.totalorder %s29_s20, %s29_s20 }
  0x2d   :  { %p1151_p5 = scmp.ne.s32.totalorder %s29_s20, %s1150_s24  ;;  %p1156_p7 = scmp.lt.s32.totalorder %s1150_s24, %s1150_s24 }
  0x2f   :  { %p1157_p8 = por %p1156_p7, %p1155_p6 }
  0x31   :  { %p1158_p9 = pnand %p1157_p8, %p1151_p5 }
  0x33   :  { %1161 = shalt.err (!%p1158_p9)
}
  0x34   :  { %31 = dma.hbm_to_vmem [thread:$0]  %s1507_s0, 32, %s29_s20, [#allocation3]  }
  0x35   :  { %s1265_s25 = smov [#allocation7]   ;;  %s1266_s27 = smov [#allocation10]  }
  0x36   :  { %s49_s26 = sshll.u32 %s1265_s25, 4  ;;  %s77_s28 = sshll.u32 %s1266_s27, 4  ;;  %s50_s26 = int_to_ptr.vmem [resolvable:$true] %s49_s26  ;;  %s78_s28 = int_to_ptr.vmem [resolvable:$true] %s77_s28 }
  0x37   :  { %s1162_s29 = scalar_lea.hbm %s1509_s2, 256 }
  0x38   :  { %p1163_p10 = scmp.ne.s32.totalorder %s1509_s2, %s1162_s29  ;;  %p1166_p11 = scmp.lt.u32.totalorder %s1162_s29, %s1509_s2 }
  0x3a   :  { %p1168_p12 = pnand %p1166_p11, %p1163_p10 }
  0x3c   :  { %1171 = shalt.err (!%p1168_p12)
}
  0x3d   :  { %s1172_s0 = scalar_lea.vmem %s50_s26, 256  ;;  %p1177_p0 = scmp.lt.s32.totalorder %s50_s26, %s50_s26 }
  0x3e   :  { %p1173_p13 = scmp.ne.s32.totalorder %s50_s26, %s1172_s0  ;;  %p1178_p1 = scmp.lt.s32.totalorder %s1172_s0, %s1172_s0 }
  0x40   :  { %p1179_p2 = por %p1178_p1, %p1177_p0 }
  0x42   :  { %p1180_p3 = pnand %p1179_p2, %p1173_p13 }
  0x44   :  { %1183 = shalt.err (!%p1180_p3)
}
  0x45   :  { %55 = dma.hbm_to_vmem [thread:$0]  %s1509_s2, 256, %s50_s26, [#allocation6], %s1261_s13, %s1261_s13, %s1262_s14  }
  0x46   :  { %s1184_s24 = scalar_lea.hbm %s1513_s6, 512 }
  0x47   :  { %p1185_p4 = scmp.ne.s32.totalorder %s1513_s6, %s1184_s24  ;;  %p1188_p5 = scmp.lt.u32.totalorder %s1184_s24, %s1513_s6 }
  0x49   :  { %p1190_p6 = pnand %p1188_p5, %p1185_p4 }
  0x4b   :  { %1193 = shalt.err (!%p1190_p6)
}
  0x4c   :  { %s1194_s1 = scalar_lea.vmem %s78_s28, 512  ;;  %p1199_p8 = scmp.lt.s32.totalorder %s78_s28, %s78_s28 }
  0x4d   :  { %p1195_p7 = scmp.ne.s32.totalorder %s78_s28, %s1194_s1  ;;  %p1200_p9 = scmp.lt.s32.totalorder %s1194_s1, %s1194_s1 }
  0x4f   :  { %p1201_p10 = por %p1200_p9, %p1199_p8 }
  0x51   :  { %p1202_p11 = pnand %p1201_p10, %p1195_p7 }
  0x53   :  { %1205 = shalt.err (!%p1202_p11)
}
  0x54   :  { %83 = dma.hbm_to_vmem [thread:$0]  %s1513_s6, 512, %s78_s28, [#allocation9], %s1261_s13, %s1261_s13, %s1262_s14  }
  0x55   :  { %s1267_s22 = smov [#allocation11]   ;;  %s1206_s16 = scalar_lea.hbm %s1515_s8, 512 }
  0x56   :  { %s91_s29 = sshll.u32 %s1267_s22, 4  ;;  %p1207_p12 = scmp.ne.s32.totalorder %s1515_s8, %s1206_s16  ;;  %s92_s29 = int_to_ptr.vmem [resolvable:$true] %s91_s29 }
  0x57   :  { %p1210_p13 = scmp.lt.u32.totalorder %s1206_s16, %s1515_s8 }
  0x59   :  { %p1212_p0 = pnand %p1210_p13, %p1207_p12 }
  0x5b   :  { %1215 = shalt.err (!%p1212_p0)
}
  0x5c   :  { %s1216_s21 = scalar_lea.vmem %s92_s29, 512  ;;  %p1221_p2 = scmp.lt.s32.totalorder %s92_s29, %s92_s29 }
  0x5d   :  { %p1217_p1 = scmp.ne.s32.totalorder %s92_s29, %s1216_s21  ;;  %p1222_p3 = scmp.lt.s32.totalorder %s1216_s21, %s1216_s21 }
  0x5f   :  { %p1223_p4 = por %p1222_p3, %p1221_p2 }
  0x61   :  { %p1224_p5 = pnand %p1223_p4, %p1217_p1 }
  0x63   :  { %1227 = shalt.err (!%p1224_p5)
}
  0x64   :  { %97 = dma.hbm_to_vmem [thread:$0]  %s1515_s8, 512, %s92_s29, [#allocation12], %s1261_s13, %s1261_s13, %s1262_s14  }
  0x65   :  { %1250 = dma.done.wait [#allocation3], 32  }
  0x66   :  { %1251 = vsyncadd [#allocation3], 4294967264 }
  0x67   :  { %1252 = dma.done.wait [#allocation6], 512  }
  0x68   :  { %1253 = vsyncadd [#allocation6], 4294966784 }
  0x69   :  { %1254 = dma.done.wait [#allocation9], 896  }
  0x6a   :  { %1255 = vsyncadd [#allocation9], 4294966400 }
  0x6b   :  { %1256 = dma.done.wait [#allocation12], 512  }
  0x6c   :  { %1257 = vsyncadd [#allocation12], 4294966784  ;;  %v1268_v0 = vmov 0.0|0.0   ;;  %vm1269_vm0 = vmmov 0   ;;  %v1270_v1 = vmov 0.0   ;;  %v125_v2 = vld [vmem:[#allocation7] sm:$0xff]  ;;  %v501_v41 = vlaneseq }
  0x6d   :  { %1051 = vmatprep.subr.bf16.mxu0 %v1268_v0  ;;  %997 = vmatprep.mubr.msk.f32.mxu0 %vm1269_vm0, %v1270_v1  ;;  %923 = vst [vmem:[#allocation13] sm:$0x3] %v1270_v1  ;;  %v126_v3 = vld [vmem:[#allocation7 + $0x8] sm:$0xff]  ;;  %v128_v4 = vld [vmem:[#allocation8] sm:$0xff]  ;;  %vm233_vm1 = vcmask 195584   ;;  %v129_v6 = vld [vmem:[#allocation8 + $0x8] sm:$0xff] }
  0x6e   :  { %v1052_v5 = vpack.c.bf16 %v126_v3, %v125_v2  ;;  %v1054_v7 = vpack.c.bf16 %v129_v6, %v128_v4  ;;  %v123_v8 = vld [vmem:[#allocation5] sm:$0xff]  ;;  %v132_v9 = vld [vmem:[#allocation10] sm:$0xff]  ;;  %vm150_vm2 = vcmask 130048   ;;  %v130_v11 = vld [vmem:[#allocation8 + $0x10] sm:$0xff]  ;;  %vm327_vm4 = vcmask 261120   ;;  %s1273_s1 = smov [#allocation13]  }
  0x6f   :  { %v122_v10 = vld [vmem:[#allocation2] sm:$0x3]  ;;  %1006 = vmatprep.mubr.msk.f32.mxu1 %vm233_vm1, %v123_v8  ;;  %v133_v12 = vld [vmem:[#allocation10 + $0x8] sm:$0xff]  ;;  %v124_v14 = vld [vmem:[#allocation5 + $0x8] sm:$0xff]  ;;  %v1271_v39 = vmov 1966171168  }
  0x70   :  { %1053 = vmatpush3.bf16.msra.mxu0 %v1052_v5  ;;  %1055 = vmatprep.subr.bf16.mxu1 %v1054_v7  ;;  %v1059_v13 = vpack.c.bf16 %v133_v12, %v132_v9  ;;  %v134_v15 = vld [vmem:[#allocation10 + $0x10] sm:$0xff]  ;;  %v135_v16 = vld [vmem:[#allocation10 + $0x18] sm:$0xff]  ;;  %v137_v17 = vld [vmem:[#allocation11] sm:$0xff]  ;;  %v499_v40 = vunpack.c.l.s4 %v1271_v39  ;;  %v502_v44 = vshrl.u32 %v501_v41, 7  ;;  %vm670_vm10 = vcmask 57344   ;;  %s936_s2 = sshll.u32 %s1273_s1, 4  ;;  %s937_s2 = int_to_ptr.vmem [resolvable:$true] %s936_s2 }
  0x71   :  { %1058 = vmatprep.subr.bf16.mxu0 %v1268_v0  ;;  %1057 = vmatpush3.bf16.msra.mxu1 %v1054_v7  ;;  %v1062_v18 = vpack.c.bf16 %v135_v16, %v134_v15  ;;  %v138_v19 = vld [vmem:[#allocation11 + $0x8] sm:$0xff]  ;;  %v139_v21 = vld [vmem:[#allocation11 + $0x10] sm:$0xff]  ;;  %v140_v22 = vld [vmem:[#allocation11 + $0x18] sm:$0xff]  ;;  %vm696_vm11 = vcmask 64512   ;;  %vm873_vm12 = vcmask 1041409   ;;  %vm876_vm13 = vcmask 254976   ;;  %p1233_p7 = scmp.lt.s32.totalorder %s937_s2, %s937_s2 }
  0x72   :  { %1004 = vmatprep.subr.mxu1 %v130_v11  ;;  %v1064_v20 = vpack.c.bf16 %v138_v19, %v137_v17  ;;  %v1068_v23 = vpack.c.bf16 %v140_v22, %v139_v21  ;;  %v948_v24 = vld [vmem:[%s1510_s3] ss:$0 sm:$0xff]  ;;  %v500_v43 = vunpack.c.0.s8 %v499_v40  ;;  %s1228_s26 = scalar_lea.vmem %s937_s2, 32 }
  0x73   :  { %998 = vmatmul.mubr.msk.f32.vlgmr.msra.gmra.mrb[0].mxu0 %vm150_vm2, %v122_v10  ;;  %v950_v28 = vld [vmem:[%s1512_s5] ss:$0 sm:$0xff]  ;;  %p1229_p6 = scmp.ne.s32.totalorder %s937_s2, %s1228_s26  ;;  %p1234_p8 = scmp.lt.s32.totalorder %s1228_s26, %s1228_s26 }
  0x74   :  { %1060 = vmatpush3.bf16.msra.mxu0 %v1059_v13  ;;  %1017 = vmatprep.mubr.msk.f32.mxu0 %vm1269_vm0, %v1270_v1  ;;  %v953_v42 = vld [vmem:[%s1514_s7] ss:$0 sm:$0xff]  ;;  %v503_v48 = vsub.s32 %v500_v43, %v502_v44  ;;  %s1272_s7 = smov 96  }
  0x75   :  { %1061 = vmatprep.subr.bf16.mxu0 %v1268_v0  ;;  %1005 = vmatpush3.msra.mxu1 %v130_v11  ;;  %v955_v50 = vld [vmem:[%s1516_s9] ss:$0 sm:$0xff]  ;;  %p1235_p9 = por %p1234_p8, %p1233_p7 }
  0x76   :  { %1007 = vmatmul.mubr.msk.f32.vlgmr.msra.gmra.mrb[0].mxu1 %vm233_vm1, %v124_v14  ;;  %1065 = vmatprep.subr.bf16.mxu1 %v1064_v20 }
  0x77   :  { %1067 = vmatpush3.bf16.msra.mxu1 %v1064_v20  ;;  %p1236_p10 = pnand %p1235_p9, %p1229_p6 }
  0x78   :  { %1063 = vmatpush3.bf16.msra.mxu0 %v1062_v18  ;;  %1069 = vmatprep.subr.bf16.mxu1 %v1068_v23 }
  0x79   :  { %1031 = vmatprep.subr.mxu0 %v1270_v1 }
  0x7b   :  { %1071 = vmatpush3.bf16.msra.mxu1 %v1068_v23 }
  0x7c   :  { %1036 = vmatprep.subr.mxu1 %v1270_v1 }
 0x146   :  { %v220_v25 = vpop.f32.mrb[0].mxu0 }
 0x147   :  { %v221_v26 = vadd.f32 %v948_v24, %v220_v25  ;;  %v999_v27 = vpop.f32.mrb[1].mxu0 }
 0x149   :  { %vm224_vm3 = vcmp.ge.f32.partialorder %v221_v26, 0.0  ;;  %v225_v29 = vmul.f32 0.01, %v221_v26  ;;  %v1008_v30 = vpop.f32.mrb[0].mxu1 }
 0x14a   :  { %v312_v32 = vadd.f32 %v1008_v30, %v950_v28  ;;  %v306_v33 = vpop.f32.mrb[1].mxu1 }
 0x14b   :  { %v1441_v31 = vsel %vm224_vm3, %v221_v26, %v225_v29  ;;  %v307_v34 = vadd.f32 %v950_v28, %v306_v33 }
 0x14c   :  { %1018 = vmatmul.mubr.msk.f32.vlgmr.msra.gmra.mrb[2].mxu0 %vm327_vm4, %v1441_v31  ;;  %v318_v35 = vmul.f32 0.01, %v312_v32  ;;  %vm316_vm5 = vcmp.ge.f32.partialorder %v312_v32, 0.0 }
 0x14d   :  { %1033 = vmatprep.mubr.msk.f32.mxu0 %vm1269_vm0, %v1270_v1  ;;  %vm315_vm6 = vcmp.ge.f32.partialorder %v307_v34, 0.0  ;;  %v317_v36 = vmul.f32 0.01, %v307_v34 }
 0x14e   :  { %v1449_v38 = vsel %vm316_vm5, %v312_v32, %v318_v35 }
 0x14f   :  { %v1447_v37 = vsel %vm315_vm6, %v307_v34, %v317_v36  ;;  %v853_v24 = vsel %vm327_vm4, %v1449_v38, 0.0 }
 0x150   :  { %1028 = vmatprep.mubr.msk.f32.mxu1 %vm327_vm4, %v1447_v37  ;;  %v854_v25 = vrot.slane %v853_v24, 4  ;;  %v846_v26 = vsel %vm327_vm4, %v1447_v37, 0.0 }
 0x151   :  { %1029 = vmatmul.mubr.msk.f32.vlgmr.msra.gmra.mrb[2].mxu1 %vm327_vm4, %v1449_v38  ;;  %v847_v27 = vrot.slane %v846_v26, 4  ;;  %v865_v38 = vrot.slane %v1441_v31, 1 }
 0x152   :  { %1038 = vmatprep.mubr.msk.f32.mxu1 %vm1269_vm0, %v1270_v1  ;;  %v855_v28 = vadd.f32 %v854_v25, %v853_v24 }
 0x153   :  { %v848_v29 = vadd.f32 %v847_v27, %v846_v26 }
 0x154   :  { %v856_v30 = vrot.slane %v855_v28, 2 }
 0x155   :  { %v849_v33 = vrot.slane %v848_v29, 2 }
 0x156   :  { %v857_v32 = vadd.f32 %v856_v30, %v855_v28 }
 0x157   :  { %v850_v35 = vadd.f32 %v849_v33, %v848_v29 }
 0x158   :  { %v858_v34 = vrot.slane %v857_v32, 1 }
 0x159   :  { %v851_v39 = vrot.slane %v850_v35, 1 }
 0x15a   :  { %v859_v36 = vadd.f32 %v858_v34, %v857_v32 }
 0x15b   :  { %v852_v41 = vadd.f32 %v851_v39, %v850_v35 }
 0x15c   :  { %v862_v40 = vmul.f32 0.125, %v859_v36 }
 0x21f   :  { %v397_v45 = vpop.f32.mrb[2].mxu0 }
 0x220   :  { %v398_v46 = vadd.f32 %v953_v42, %v397_v45  ;;  %v1019_v47 = vpop.f32.mrb[3].mxu0 }
 0x222   :  { %vm401_vm7 = vcmp.ge.f32.partialorder %v398_v46, 0.0  ;;  %v402_v49 = vmul.f32 0.01, %v398_v46 }
 0x224   :  { %v403_v51 = vsel %vm401_vm7, %v398_v46, %v402_v49  ;;  %v1030_v53 = vpop.f32.mrb[2].mxu1  ;;  %v861_v46 = vmul.f32 0.125, %v852_v41 }
 0x225   :  { %v504_v52 = vrot.slane %v403_v51, %v503_v48  ;;  %v488_v54 = vadd.f32 %v1030_v53, %v955_v50  ;;  %v482_v55 = vpop.f32.mrb[3].mxu1 }
 0x226   :  { %v483_v56 = vadd.f32 %v955_v50, %v482_v55 }
 0x227   :  { %v505_v57 = vcombine.high %v504_v52, %v504_v52  ;;  %vm492_vm8 = vcmp.ge.f32.partialorder %v488_v54, 0.0  ;;  %v494_v58 = vmul.f32 0.01, %v488_v54  ;;  %v512_v63 = vrot.slane %v504_v52, %v503_v48 }
 0x228   :  { %vm491_vm9 = vcmp.ge.f32.partialorder %v483_v56, 0.0  ;;  %v493_v59 = vmul.f32 0.01, %v483_v56 }
 0x229   :  { %v496_v60 = vsel %vm492_vm8, %v488_v54, %v494_v58  ;;  %v519_v62 = vrot.slane %v505_v57, %v503_v48 }
 0x22a   :  { %v495_v61 = vsel %vm491_vm9, %v483_v56, %v493_v59  ;;  %1037 = vmatpush3.xpose.msk.msra.mxu1 %vm327_vm4, %v496_v60 }
 0x22b   :  { %1032 = vmatpush3.xpose.msk.msra.mxu0 %vm327_vm4, %v495_v61  ;;  %1046 = vmatprep.subr.mxu1 %v1270_v1 }
 0x22c   :  { %1041 = vmatprep.subr.mxu0 %v1270_v1 }
 0x22d   :  { %1039 = vmatmul.mubr.msk.f32.vlgmr.msra.gmra.mrb[4].mxu1 %vm327_vm4, %v519_v62 }
 0x22e   :  { %1034 = vmatmul.mubr.msk.f32.vlgmr.msra.gmra.mrb[4].mxu0 %vm327_vm4, %v512_v63  ;;  %1048 = vmatprep.mubr.msk.f32.mxu1 %vm1269_vm0, %v1270_v1 }
 0x22f   :  { %1043 = vmatprep.mubr.msk.f32.mxu0 %vm1269_vm0, %v1270_v1 }
 0x300   :  { %v666_v0 = vpop.f32.mrb[4].mxu1 }
 0x301   :  { %v591_v2 = vpop.f32.mrb[4].mxu0  ;;  %v1040_v3 = vpop.f32.mrb[5].mxu1  ;;  %v674_v4 = vsel %vm670_vm10, %v666_v0, -inf }
 0x302   :  { %675 = vmax.xlane.f32.xlu0 %v674_v4  ;;  %v1035_v5 = vpop.f32.mrb[5].mxu0  ;;  %v671_v6 = vsel %vm670_vm10, %v591_v2, -inf }
 0x303   :  { %v964_v5 = vld [vmem:[%s1517_s10] ss:$0 sm:$0xff] }
 0x306   :  { %672 = vmax.xlane.f32.xlu0 %v671_v6 }
 0x31c   :  { %770 = vrot.lane.b32.xlu0 %v496_v60, %s1272_s7 }
 0x38f   :  { %v676_v7 = vpop.xlane.xlu0 %675 }
 0x390   :  { %v678_v8 = vsub.f32 %v666_v0, %v676_v7 }
 0x392   :  { %v681_v9 = vmul.f32 1.442695, %v678_v8 }
 0x393   :  { %v673_v10 = vpop.xlane.xlu0 %672 }
 0x394   :  { %1086 = vpow2.f32 %v681_v9  ;;  %v677_v11 = vsub.f32 %v591_v2, %v673_v10  ;;  %v965_v9 = vld [vmem:[%s1518_s11] ss:$0 sm:$0xff] }
 0x396   :  { %v679_v1 = vmul.f32 1.442695, %v677_v11 }
 0x397   :  { %v771_v12 = vpop.permute.xlu0 %770 }
 0x398   :  { %1088 = vpow2.f32 %v679_v1  ;;  %1047 = vmatpush3.msra.mxu1 %v771_v12 }
 0x39e   :  { %v1087_v13 = vpop.eup %1086 }
 0x39f   :  { %v686_v14 = vsel %vm670_vm10, %v1087_v13, 0.0 }
 0x3a0   :  { %687 = vadd.xlane.f32.xlu1 %v686_v14 }
 0x3a2   :  { %v1089_v15 = vpop.eup %1088 }
 0x3a3   :  { %v683_v16 = vsel %vm670_vm10, %v1089_v15, 0.0 }
 0x3a4   :  { %684 = vadd.xlane.f32.xlu1 %v683_v16 }
 0x3b5   :  { %693 = vrot.lane.b32.xlu1 %v495_v61, %s1272_s7 }
 0x42d   :  { %v688_v17 = vpop.xlane.xlu1 %687 }
 0x42e   :  { %1090 = vrcp.f32 %v688_v17 }
 0x431   :  { %v685_v18 = vpop.xlane.xlu1 %684 }
 0x432   :  { %1092 = vrcp.f32 %v685_v18 }
 0x435   :  { %v694_v19 = vpop.permute.xlu1 %693 }
 0x436   :  { %1042 = vmatpush3.msra.mxu0 %v694_v19 }
 0x438   :  { %v1091_v20 = vpop.eup %1090 }
 0x439   :  { %v692_v21 = vmul.f32 %v1091_v20, %v1087_v13 }
 0x43b   :  { %1049 = vmatmul.mubr.msk.f32.vlgmr.msra.gmra.mrb[6].mxu1 %vm696_vm11, %v692_v21 }
 0x43c   :  { %v1093_v22 = vpop.eup %1092 }
 0x43d   :  { %v691_v23 = vmul.f32 %v1093_v22, %v1089_v15 }
 0x43f   :  { %1044 = vmatmul.mubr.msk.f32.vlgmr.msra.gmra.mrb[6].mxu0 %vm696_vm11, %v691_v23 }
 0x50e   :  { %v842_v42 = vpop.f32.mrb[6].mxu1 }
 0x50f   :  { %v864_v43 = vadd.f32 %v862_v40, %v842_v42  ;;  %v1050_v44 = vpop.f32.mrb[7].mxu1 }
 0x511   :  { %v869_v45 = vadd.f32 %v865_v38, %v864_v43 }
 0x512   :  { %v766_v37 = vpop.f32.mrb[6].mxu0 }
 0x513   :  { %v863_v47 = vadd.f32 %v861_v46, %v766_v37  ;;  %v1045_v48 = vpop.f32.mrb[7].mxu0  ;;  %v872_v49 = vrot.slane %v869_v45, 7 }
 0x515   :  { %v868_v50 = vadd.f32 %v863_v47, %v1441_v31 }
 0x517   :  { %v874_v51 = vsel %vm873_vm12, %v872_v49, %v868_v50 }
 0x518   :  { %v877_v52 = vsel %vm876_vm13, %v874_v51, 0.0 }
 0x519   :  { %878 = vadd.xlane.f32.xlu1 %v877_v52 }
 0x5a6   :  { %v879_v53 = vpop.xlane.xlu1 %878 }
 0x5a7   :  { %v881_v54 = vmul.f32 0.03125, %v879_v53 }
 0x5a9   :  { %v883_v55 = vrot.slane %v881_v54, 1  ;;  %v886_v56 = vsub.f32 %v868_v50, %v881_v54 }
 0x5ab   :  { %v887_v57 = vsub.f32 %v869_v45, %v883_v55  ;;  %v888_v59 = vmul.f32 %v886_v56, %v886_v56 }
 0x5ad   :  { %v889_v58 = vmul.f32 %v887_v57, %v887_v57 }
 0x5af   :  { %v892_v60 = vrot.slane %v889_v58, 7 }
 0x5b1   :  { %v893_v61 = vsel %vm873_vm12, %v892_v60, %v888_v59 }
 0x5b2   :  { %v895_v62 = vsel %vm876_vm13, %v893_v61, 0.0 }
 0x5b3   :  { %896 = vadd.xlane.f32.xlu0 %v895_v62 }
 0x640   :  { %v897_v31 = vpop.xlane.xlu0 %896 }
 0x641   :  { %v898_v63 = vmul.f32 0.03125, %v897_v31 }
 0x643   :  { %v899_v0 = vadd.f32 1e-05, %v898_v63 }
 0x645   :  { %1094 = vrsqrt.f32 %v899_v0 }
 0x64f   :  { %v1095_v2 = vpop.eup %1094 }
 0x650   :  { %v902_v3 = vrot.slane %v1095_v2, 1  ;;  %v905_v4 = vmul.f32 %v1095_v2, %v886_v56 }
 0x652   :  { %v906_v6 = vmul.f32 %v902_v3, %v887_v57  ;;  %v913_v7 = vmul.f32 %v964_v5, %v905_v4 }
 0x654   :  { %v914_v8 = vmul.f32 %v964_v5, %v906_v6  ;;  %v921_v11 = vadd.f32 %v965_v9, %v913_v7 }
 0x656   :  { %v922_v10 = vadd.f32 %v965_v9, %v914_v8 }
 0x658   :  { %v926_v1 = vrot.slane %v922_v10, 7 }
 0x65a   :  { %v927_v12 = vsel %vm873_vm12, %v926_v1, %v921_v11 }
 0x65b   :  { %929 = vst.msk [vmem:[#allocation13] sm:$0x3] %vm876_vm13, %v927_v12 }
 0x65c   :  { %1239 = shalt.err (!%p1236_p10)
}
 0x65d   :  { %s1240_s11 = scalar_lea.hbm %s1519_s12, 32 }
 0x65e   :  { %p1241_p11 = scmp.ne.s32.totalorder %s1519_s12, %s1240_s11  ;;  %p1244_p12 = scmp.lt.u32.totalorder %s1240_s11, %s1519_s12 }
 0x660   :  { %p1246_p13 = pnand %p1244_p12, %p1241_p11 }
 0x662   :  { %1249 = shalt.err (!%p1246_p13)
}
 0x663   :  { %939 = dma.vmem_to_hbm [thread:$0]  %s937_s2, 32, %s1519_s12, [#allocation4]  }
 0x664   :  { %1258 = dma.done.wait [#allocation4], 32  }
 0x665   :  { %1259 = vsyncadd [#allocation4], 4294967264 }
 0x666   :  { %943 = vsyncpa [#allocation3], 1 }
 0x667   :  { %944 = vsyncpa [#allocation6], 1 }
 0x668   :  { %945 = vsyncpa [#allocation9], 1 }
 0x669   :  { %946 = vsyncpa [#allocation12], 1 }
 0x66a   :  { %947 = vsyncpa [#allocation4], 1 }

</bundles_post_ra>
